<compile_context>
chip_gen: v7x
topology: tpu7x:2x2x1
jax: 0.10.0
libtpu: 0.0.40
codegen_flags: <defaults>
</compile_context>

<pallas_src>
import jax
import jax.numpy as jnp
from jax.experimental import pallas as pl
from jax.experimental.pallas import tpu as pltpu

LANE = 128              # samples per lane-block (vreg lane width)
BLOCKS_PER_STEP = 1024  # lane-blocks per grid step (multiple of 8)


def logreg_kernel(x_ref, w_ref, b_ref, o_ref):
    # x_ref: [TBLK, IN, LANE]  (IN on sublanes, 128 samples on lanes)
    # w_ref: [IN, LANE]        (weight row broadcast across lanes), resident
    # b_ref: [1, 1]            scalar bias in SMEM
    # o_ref: [TBLK, LANE]      lane-dense output (sample = block*LANE + lane)
    x = x_ref[...]
    w = w_ref[...]
    # VPU multiply + sublane (cross-sublane) reduce over the IN=8 axis.
    z = jnp.sum(x * w[None, :, :], axis=1) + b_ref[0, 0]        # [TBLK, LANE]
    # Sigmoid runs on the EUP slot; fully hidden under the memory-bound loop.
    o_ref[...] = jax.nn.sigmoid(z).astype(o_ref.dtype)


def net_forward(x, w, b, *, blocks_per_step=BLOCKS_PER_STEP):
    """x: [B, 8] f32, w: [1, 8] f32 (PyTorch Linear weight), b: [1] f32 -> [B, 1] f32."""
    B, IN = x.shape
    OUT = w.shape[0]
    assert OUT == 1

    # --- wrapper-side layout plumbing: pad batch and put it on the lane axis ---
    n_blocks = -(-B // LANE)
    b_pad = n_blocks * LANE
    if b_pad != B:
        x = jnp.pad(x, ((0, b_pad - B), (0, 0)))
    # [B_pad, IN] -> [n_blocks, LANE, IN] -> [n_blocks, IN, LANE]
    x_blk = jnp.transpose(x.reshape(n_blocks, LANE, IN), (0, 2, 1))

    if n_blocks <= blocks_per_step:
        tblk = n_blocks                 # single step; block dim == full array dim
        n_steps = 1
        n_blocks_pad = n_blocks
    else:
        tblk = blocks_per_step          # multiple of 8 -> legal sublane tiling
        n_steps = -(-n_blocks // tblk)
        n_blocks_pad = n_steps * tblk
        if n_blocks_pad != n_blocks:
            x_blk = jnp.pad(x_blk, ((0, n_blocks_pad - n_blocks), (0, 0), (0, 0)))

    w_bcast = jnp.broadcast_to(w.reshape(IN, 1), (IN, LANE)).astype(jnp.float32)
    b_smem = b.reshape(1, 1).astype(jnp.float32)

    out = pl.pallas_call(
        logreg_kernel,
        out_shape=jax.ShapeDtypeStruct((n_blocks_pad, LANE), jnp.float32),
        grid_spec=pl.GridSpec(
            grid=(n_steps,),
            in_specs=[
                pl.BlockSpec((tblk, IN, LANE), lambda i: (i, 0, 0)),   # batch tile
                pl.BlockSpec((IN, LANE), lambda i: (0, 0)),            # resident weights
                pl.BlockSpec(memory_space=pltpu.MemorySpace.SMEM),     # scalar bias
            ],
            out_specs=pl.BlockSpec((tblk, LANE), lambda i: (i, 0)),
        ),
        compiler_params=pltpu.CompilerParams(
            dimension_semantics=("parallel",)),
    )(x_blk, w_bcast, b_smem)

    # Undo the lane-major layout: out[n, l] is the result for sample n*LANE + l.
    return out.reshape(-1)[:B].reshape(B, OUT)


if __name__ == "__main__":
    key = jax.random.PRNGKey(0)
    kx, kw, kb, kx2 = jax.random.split(key, 4)

    B, IN, OUT = 8, 8, 1
    x = jax.random.normal(kx, (B, IN), dtype=jnp.float32)
    # Deterministic parameter init mimicking nn.Linear's uniform(-1/sqrt(8), 1/sqrt(8))
    bound = 1.0 / jnp.sqrt(jnp.float32(IN))
    w = jax.random.uniform(kw, (OUT, IN), dtype=jnp.float32, minval=-bound, maxval=bound)
    b = jax.random.uniform(kb, (OUT,), dtype=jnp.float32, minval=-bound, maxval=bound)

    out = net_forward(x, w, b)
    jax.block_until_ready(out)

    ref = jax.nn.sigmoid(x @ w.T + b)
    assert out.shape == (B, OUT)
    assert jnp.allclose(out, ref, atol=1e-5, rtol=1e-5)

    # Secondary check: batch not a multiple of 128 (exercises the pad path).
    B2 = 300
    x2 = jax.random.normal(kx2, (B2, IN), dtype=jnp.float32)
    out2 = net_forward(x2, w, b)
    jax.block_until_ready(out2)
    ref2 = jax.nn.sigmoid(x2 @ w.T + b)
    assert out2.shape == (B2, OUT)
    assert jnp.allclose(out2, ref2, atol=1e-5, rtol=1e-5)

    print("KERNEL_OK")
</pallas_src>

<mosaic_0001>
module attributes {stable_mosaic.version = 11 : i64} {
  func.func @logreg_kernel(%arg0: i32, %arg1: memref<1x8x128xf32, #tpu.memory_space<vmem>>, %arg2: memref<8x128xf32, #tpu.memory_space<vmem>>, %arg3: memref<1x1xf32, #tpu.memory_space<smem>>, %arg4: memref<1x128xf32, #tpu.memory_space<vmem>>) attributes {dimension_semantics = [#tpu.dimension_semantics<parallel>], iteration_bounds = array<i64: 1>, scalar_prefetch = 0 : i64, scratch_operands = 0 : i64, tpu.core_type = #tpu.core_type<tc>, window_params = [{transform_indices = @transform_0, window_bounds = array<i64: 1, 8, 128>}, {pipeline_mode = #tpu.pipeline_mode<synchronous>, transform_indices = @transform_1, window_bounds = array<i64: 8, 128>}, {transform_indices = @transform_2, window_bounds = array<i64: 1, 1>}, {transform_indices = @transform_3, window_bounds = array<i64: 1, 128>}]} {
    %c0 = arith.constant 0 : index
    %c0_0 = arith.constant 0 : index
    %c0_1 = arith.constant 0 : index
    %0 = vector.load %arg1[%c0, %c0_0, %c0_1] : memref<1x8x128xf32, #tpu.memory_space<vmem>>, vector<1x8x128xf32>
    %c0_2 = arith.constant 0 : index
    %c0_3 = arith.constant 0 : index
    %1 = vector.load %arg2[%c0_2, %c0_3] : memref<8x128xf32, #tpu.memory_space<vmem>>, vector<8x128xf32>
    %2 = vector.shape_cast %1 : vector<8x128xf32> to vector<1x8x128xf32>
    %3 = arith.mulf %0, %2 : vector<1x8x128xf32>
    %cst = arith.constant dense<0.000000e+00> : vector<1x128xf32>
    %4 = vector.multi_reduction <add>, %3, %cst [1] : vector<1x8x128xf32> to vector<1x128xf32>
    %c0_4 = arith.constant 0 : index
    %c0_5 = arith.constant 0 : index
    %5 = memref.load %arg3[%c0_4, %c0_5] : memref<1x1xf32, #tpu.memory_space<smem>>
    %6 = vector.broadcast %5 : f32 to vector<1x128xf32>
    %7 = arith.addf %4, %6 : vector<1x128xf32>
    %8 = arith.negf %7 : vector<1x128xf32>
    %9 = math.exp %8 : vector<1x128xf32>
    %cst_6 = arith.constant 1.000000e+00 : f32
    %10 = vector.broadcast %cst_6 : f32 to vector<1x128xf32>
    %11 = arith.addf %10, %9 : vector<1x128xf32>
    %12 = arith.divf %10, %11 : vector<1x128xf32>
    %c0_7 = arith.constant 0 : index
    %c0_8 = arith.constant 0 : index
    %13 = vector.load %arg4[%c0_7, %c0_8] : memref<1x128xf32, #tpu.memory_space<vmem>>, vector<1x128xf32>
    tpu.vector_store %arg4[%c0_7, %c0_8], %12 {strides = array<i32>} : memref<1x128xf32, #tpu.memory_space<vmem>>, vector<1x128xf32>,
    return
  }
  func.func @transform_0(%arg0: i32) -> (i32, i32, i32) {
    %c0_i32 = arith.constant 0 : i32
    %c0_i32_0 = arith.constant 0 : i32
    %c0_i32_1 = arith.constant 0 : i32
    return %arg0, %c0_i32, %c0_i32_0 : i32, i32, i32
  }
  func.func @transform_1(%arg0: i32) -> (i32, i32) {
    %c0_i32 = arith.constant 0 : i32
    %c0_i32_0 = arith.constant 0 : i32
    %c0_i32_1 = arith.constant 0 : i32
    return %c0_i32, %c0_i32_0 : i32, i32
  }
  func.func @transform_2(%arg0: i32) -> (i32, i32) {
    %c0_i32 = arith.constant 0 : i32
    %c0_i32_0 = arith.constant 0 : i32
    %c0_i32_1 = arith.constant 0 : i32
    return %c0_i32, %c0_i32_0 : i32, i32
  }
  func.func @transform_3(%arg0: i32) -> (i32, i32) {
    %c0_i32 = arith.constant 0 : i32
    %c0_i32_0 = arith.constant 0 : i32
    return %arg0, %c0_i32 : i32, i32
  }
}

</mosaic_0001>

<bundles_post_ra>
// kernel: tpu_custom_call.1
= control target key start
LH: loop header
LB: loop body
LE: loop exit
PB: predicated region body
PF: predicated region fallthrough
CT: control target
= control target key end

     0   :  { %9 = vsyncpa [#allocation4], 0  ;;  %s217_s0 = inlined_call_operand.hbm [shape: f32[1,8,128], index: 0, kind: input, shape index: {}]   ;;  %s218_s1 = inlined_call_operand.hbm [shape: f32[8,128], index: 1, kind: input, shape index: {}]   ;;  %s219_s2 = inlined_call_operand.<no memory space> [shape: f32[1,1], index: 2, kind: input, shape index: {}]   ;;  %s220_s3 = inlined_call_operand.hbm [shape: f32[1,128], index: 3, kind: output, shape index: {}]  }
   0x1   :  { %10 = vsyncpa [#allocation7], 0 }
   0x2   :  { %11 = vsyncpa [#allocation5], 0  ;;  %s155_s12 = smov [#allocation3]   ;;  %s156_s14 = smov [#allocation6]  }
   0x3   :  { %s18_s13 = sshll.u32 %s155_s12, 4  ;;  %s28_s15 = sshll.u32 %s156_s14, 4  ;;  %s19_s13 = int_to_ptr.vmem [resolvable:$true] %s18_s13  ;;  %s29_s15 = int_to_ptr.vmem [resolvable:$true] %s28_s15 }
   0x4   :  { %s83_s18 = scalar_lea.hbm %s217_s0, 128 }
   0x5   :  { %p84_p0 = scmp.ne.s32.totalorder %s217_s0, %s83_s18  ;;  %p87_p1 = scmp.lt.u32.totalorder %s83_s18, %s217_s0 }
   0x7   :  { %p89_p2 = pnand %p87_p1, %p84_p0 }
   0x9   :  { %92 = shalt.err (!%p89_p2)
}
   0xa   :  { %s93_s23 = scalar_lea.vmem %s19_s13, 128  ;;  %p98_p4 = scmp.lt.s32.totalorder %s19_s13, %s19_s13 }
   0xb   :  { %p94_p3 = scmp.ne.s32.totalorder %s19_s13, %s93_s23  ;;  %p99_p5 = scmp.lt.s32.totalorder %s93_s23, %s93_s23 }
   0xd   :  { %p100_p6 = por %p99_p5, %p98_p4 }
   0xf   :  { %p101_p7 = pnand %p100_p6, %p94_p3 }
  0x11   :  { %104 = shalt.err (!%p101_p7)
}
  0x12   :  { %21 = dma.hbm_to_vmem [thread:$0]  %s217_s0, 128, %s19_s13, [#allocation4]  }
  0x13   :  { %s105_s28 = scalar_lea.hbm %s218_s1, 128 }
  0x14   :  { %p106_p8 = scmp.ne.s32.totalorder %s218_s1, %s105_s28  ;;  %p109_p9 = scmp.lt.u32.totalorder %s105_s28, %s218_s1 }
  0x16   :  { %p111_p10 = pnand %p109_p9, %p106_p8 }
  0x18   :  { %114 = shalt.err (!%p111_p10)
}
  0x19   :  { %s115_s6 = scalar_lea.vmem %s29_s15, 128  ;;  %p120_p12 = scmp.lt.s32.totalorder %s29_s15, %s29_s15 }
  0x1a   :  { %p116_p11 = scmp.ne.s32.totalorder %s29_s15, %s115_s6  ;;  %p121_p13 = scmp.lt.s32.totalorder %s115_s6, %s115_s6 }
  0x1c   :  { %p122_p0 = por %p121_p13, %p120_p12 }
  0x1e   :  { %p123_p1 = pnand %p122_p0, %p116_p11 }
  0x20   :  { %126 = shalt.err (!%p123_p1)
}
  0x21   :  { %31 = dma.hbm_to_vmem [thread:$0]  %s218_s1, 128, %s29_s15, [#allocation7]  }
  0x22   :  { %149 = dma.done.wait [#allocation4], 128  }
  0x23   :  { %150 = vsyncadd [#allocation4], 4294967168 }
  0x24   :  { %151 = dma.done.wait [#allocation7], 128  }
  0x25   :  { %152 = vsyncadd [#allocation7], 4294967168  ;;  %v40_v0 = vld [vmem:[#allocation3] sm:$0xff]  ;;  %v41_v1 = vld [vmem:[#allocation6] sm:$0xff]  ;;  %v50_v8 = vstv %s219_s2  ;;  %s157_s1 = smov [#allocation8]  }
  0x26   :  { %v42_v2 = vmul.f32 %v41_v1, %v40_v0  ;;  %s65_s10 = sshll.u32 %s157_s1, 4  ;;  %s66_s10 = int_to_ptr.vmem [resolvable:$true] %s65_s10 }
  0x27   :  { %s127_s11 = scalar_lea.vmem %s66_s10, 16  ;;  %s131_s12 = scalar_lea.vmem %s66_s10, 32 }
  0x28   :  { %v43_v3 = vrot.slane %v42_v2, 4  ;;  %p128_p2 = scmp.ne.s32.totalorder %s66_s10, %s127_s11  ;;  %p132_p3 = scmp.lt.s32.totalorder %s66_s10, %s66_s10 }
  0x29   :  { %p133_p4 = scmp.lt.s32.totalorder %s131_s12, %s127_s11 }
  0x2a   :  { %v44_v4 = vadd.f32 %v43_v3, %v42_v2 }
  0x2b   :  { %p134_p5 = por %p133_p4, %p132_p3 }
  0x2c   :  { %v45_v5 = vrot.slane %v44_v4, 2 }
  0x2d   :  { %p135_p6 = pnand %p134_p5, %p128_p2 }
  0x2e   :  { %v46_v6 = vadd.f32 %v45_v5, %v44_v4 }
  0x30   :  { %v47_v7 = vrot.slane %v46_v6, 1 }
  0x32   :  { %v48_v9 = vadd.f32 %v47_v7, %v46_v6 }
  0x34   :  { %v51_v10 = vadd.f32 %v50_v8, %v48_v9 }
  0x36   :  { %v75_v11 = vmul.f32 -1.442695, %v51_v10 }
  0x38   :  { %79 = vpow2.f32 %v75_v11 }
  0x42   :  { %v80_v12 = vpop.eup %79 }
  0x43   :  { %v55_v13 = vadd.f32 1.0, %v80_v12 }
  0x45   :  { %81 = vrcp.f32 %v55_v13 }
  0x4f   :  { %v82_v14 = vpop.eup %81 }
  0x50   :  { %58 = vst [vmem:[#allocation8] sm:$0x1] %v82_v14 }
  0x51   :  { %138 = shalt.err (!%p135_p6)
}
  0x52   :  { %s139_s14 = scalar_lea.hbm %s220_s3, 16 }
  0x53   :  { %p140_p7 = scmp.ne.s32.totalorder %s220_s3, %s139_s14  ;;  %p143_p8 = scmp.lt.u32.totalorder %s139_s14, %s220_s3 }
  0x55   :  { %p145_p9 = pnand %p143_p8, %p140_p7 }
  0x57   :  { %148 = shalt.err (!%p145_p9)
}
  0x58   :  { %68 = dma.vmem_to_hbm [thread:$0]  %s66_s10, 16, %s220_s3, [#allocation5]  }
  0x59   :  { %153 = dma.done.wait [#allocation5], 16  }
  0x5a   :  { %154 = vsyncadd [#allocation5], 4294967280 }
  0x5b   :  { %72 = vsyncpa [#allocation4], 1 }
  0x5c   :  { %73 = vsyncpa [#allocation7], 1 }
  0x5d   :  { %74 = vsyncpa [#allocation5], 1 }

</bundles_post_ra>
